<compile_context>
chip_gen: v5e
topology: v5e:2x2
jax: 0.10.0
libtpu: 0.0.40
codegen_flags: <defaults>
</compile_context>

<pallas_src>
import math
import jax
import jax.numpy as jnp
from jax.experimental import pallas as pl
from jax.experimental.pallas import tpu as pltpu


def conv3x3_nobias(x, w):
    """NCHW 3x3 conv, stride 1, padding 1, no bias, via a Pallas TPU kernel.

    x: (B, Cin, H, W) f32; w: (Cout, Cin, 3, 3) f32 -> (B, Cout, H, W) f32.
    """
    B, Cin, H, W = x.shape
    Cout, _, K, _ = w.shape
    pad = (K - 1) // 2
    Hp = H + 2 * pad
    Wp_min = W + 2 * pad
    # Round the padded width up so the flattened spatial axis H*Wp is a
    # multiple of 128 -> lane-dense (unmasked) output stores.
    g = 128 // math.gcd(H, 128)
    extra = (-Wp_min) % g
    Wp = Wp_min + (extra if extra <= 32 else 0)
    Lout = H * Wp                      # flattened output length (lane axis)
    Lin = Hp * Wp + 2 * pad            # flattened, halo-shifted input length

    # One pad + flatten per call (no transposes); bf16 input DMA.
    xpad = jnp.pad(x, ((0, 0), (0, 0), (pad, pad), (pad, pad + (Wp - Wp_min))))
    xflat = jnp.pad(xpad.reshape(B, Cin, Hp * Wp),
                    ((0, 0), (0, 0), (pad, pad))).astype(jnp.bfloat16)
    # Weight flattened tap-major (kh, kw, cin) to match the in-kernel im2col.
    w2d = jnp.transpose(w, (0, 2, 3, 1)).reshape(Cout, K * K * Cin)
    w2d = w2d.astype(jnp.bfloat16)

    def kernel(xf_ref, w_ref, o_ref):
        xf = xf_ref[0].astype(jnp.float32)               # (Cin, Lin); unpack once
        taps = []
        for kh in range(K):
            for kw in range(K):
                d = kh * Wp + kw                         # static lane offset
                taps.append(xf[:, d:d + Lout])           # (Cin, Lout) lane shift
        patch = jnp.concatenate(taps, axis=0)            # (K*K*Cin, Lout)
        acc = jnp.dot(w_ref[...], patch.astype(jnp.bfloat16),
                      preferred_element_type=jnp.float32)  # single bf16 MXU matmul
        o_ref[0] = acc.astype(o_ref.dtype)               # lane-dense store

    flops = 2 * B * H * W * K * K * Cin * Cout
    bytes_accessed = xflat.size * 2 + w2d.size * 2 + B * Cout * Lout * 4

    y_flat = pl.pallas_call(
        kernel,
        out_shape=jax.ShapeDtypeStruct((B, Cout, Lout), jnp.float32),
        grid=(B,),
        in_specs=[
            pl.BlockSpec((1, Cin, Lin), lambda b: (b, 0, 0)),
            pl.BlockSpec((Cout, K * K * Cin), lambda b: (0, 0)),
        ],
        out_specs=pl.BlockSpec((1, Cout, Lout), lambda b: (b, 0, 0)),
        compiler_params=pltpu.CompilerParams(
            dimension_semantics=("parallel",),
            vmem_limit_bytes=64 * 1024 * 1024,
        ),
        cost_estimate=pl.CostEstimate(
            flops=flops, transcendentals=0, bytes_accessed=bytes_accessed),
    )(xflat, w2d)

    # Drop the padded columns (cheap XLA slice) and restore (B, Cout, H, W).
    # TODO(synk): for production-size images, tile H across an extra grid axis
    # (halo of `pad` rows) and shrink the tile for v7x's 64 MiB VMEM; at these
    # toy shapes one image per grid step is the right choice.
    return y_flat.reshape(B, Cout, H, Wp)[:, :, :, pad:pad + W]


def pixel_shuffle(x, r=2):
    """torch.nn.PixelShuffle(r): (B, C*r*r, H, W) -> (B, C, H*r, W*r).  Glue."""
    B, C, H, W = x.shape
    y = x.reshape(B, C // (r * r), r, r, H, W)
    y = jnp.transpose(y, (0, 1, 4, 2, 5, 3))
    return y.reshape(B, C // (r * r), H * r, W * r)


def downsample(x, w):
    """Downsample.forward: Conv2d(C -> 2C, 3x3, pad 1, bias=False) + PixelShuffle(2)."""
    return pixel_shuffle(conv3x3_nobias(x, w), 2)


if __name__ == "__main__":
    B, n_feat, H, W = 2, 8, 16, 16
    key = jax.random.PRNGKey(0)
    kx, kw = jax.random.split(key)
    x = jax.random.normal(kx, (B, n_feat, H, W), jnp.float32)
    w = jax.random.normal(kw, (2 * n_feat, n_feat, 3, 3), jnp.float32) / math.sqrt(n_feat * 9)

    fwd = jax.jit(downsample)
    out = jax.block_until_ready(fwd(x, w))
    assert out.shape == (B, n_feat // 2, 2 * H, 2 * W), out.shape

    # Reference: identical bf16 input rounding, f32 HIGHEST-precision conv.
    xb = x.astype(jnp.bfloat16).astype(jnp.float32)
    wb = w.astype(jnp.bfloat16).astype(jnp.float32)
    ref_conv = jax.lax.conv_general_dilated(
        xb, wb, (1, 1), 'SAME',
        dimension_numbers=('NCHW', 'OIHW', 'NCHW'),
        precision=jax.lax.Precision.HIGHEST)
    ref = pixel_shuffle(ref_conv, 2)
    err = float(jnp.max(jnp.abs(out - ref)))
    assert jnp.allclose(out, ref, atol=1e-3, rtol=1e-3), f"max abs err {err}"

    print("KERNEL_OK")
</pallas_src>

<mosaic_0001>
module attributes {stable_mosaic.version = 11 : i64} {
  func.func @kernel(%arg0: i32, %arg1: memref<1x8x434xbf16, #tpu.memory_space<vmem>>, %arg2: memref<16x72xbf16, #tpu.memory_space<vmem>>, %arg3: memref<1x16x384xf32, #tpu.memory_space<vmem>>) attributes {dimension_semantics = [#tpu.dimension_semantics<parallel>], iteration_bounds = array<i64: 2>, scalar_prefetch = 0 : i64, scratch_operands = 0 : i64, tpu.core_type = #tpu.core_type<tc>, window_params = [{transform_indices = @transform_0, window_bounds = array<i64: 1, 8, 434>}, {pipeline_mode = #tpu.pipeline_mode<synchronous>, transform_indices = @transform_1, window_bounds = array<i64: 16, 72>}, {transform_indices = @transform_2, window_bounds = array<i64: 1, 16, 384>}]} {
    %c0 = arith.constant 0 : index
    %c0_0 = arith.constant 0 : index
    %c0_1 = arith.constant 0 : index
    %0 = vector.load %arg1[%c0, %c0_0, %c0_1] : memref<1x8x434xbf16, #tpu.memory_space<vmem>>, vector<1x8x434xbf16>
    %1 = vector.shape_cast %0 : vector<1x8x434xbf16> to vector<8x434xbf16>
    %2 = arith.extf %1 : vector<8x434xbf16> to vector<8x434xf32>
    %3 = vector.extract_strided_slice %2 {offsets = [0, 0], sizes = [8, 384], strides = [1, 1]} : vector<8x434xf32> to vector<8x384xf32>
    %4 = vector.extract_strided_slice %2 {offsets = [0, 1], sizes = [8, 384], strides = [1, 1]} : vector<8x434xf32> to vector<8x384xf32>
    %5 = vector.extract_strided_slice %2 {offsets = [0, 2], sizes = [8, 384], strides = [1, 1]} : vector<8x434xf32> to vector<8x384xf32>
    %6 = vector.extract_strided_slice %2 {offsets = [0, 24], sizes = [8, 384], strides = [1, 1]} : vector<8x434xf32> to vector<8x384xf32>
    %7 = vector.extract_strided_slice %2 {offsets = [0, 25], sizes = [8, 384], strides = [1, 1]} : vector<8x434xf32> to vector<8x384xf32>
    %8 = vector.extract_strided_slice %2 {offsets = [0, 26], sizes = [8, 384], strides = [1, 1]} : vector<8x434xf32> to vector<8x384xf32>
    %9 = vector.extract_strided_slice %2 {offsets = [0, 48], sizes = [8, 384], strides = [1, 1]} : vector<8x434xf32> to vector<8x384xf32>
    %10 = vector.extract_strided_slice %2 {offsets = [0, 49], sizes = [8, 384], strides = [1, 1]} : vector<8x434xf32> to vector<8x384xf32>
    %11 = vector.extract_strided_slice %2 {offsets = [0, 50], sizes = [8, 384], strides = [1, 1]} : vector<8x434xf32> to vector<8x384xf32>
    %12 = tpu.concatenate %3, %4, %5, %6, %7, %8, %9, %10, %11 in 0 : vector<8x384xf32>, vector<8x384xf32>, vector<8x384xf32>, vector<8x384xf32>, vector<8x384xf32>, vector<8x384xf32>, vector<8x384xf32>, vector<8x384xf32>, vector<8x384xf32> -> vector<72x384xf32>
    %c0_2 = arith.constant 0 : index
    %c0_3 = arith.constant 0 : index
    %13 = vector.load %arg2[%c0_2, %c0_3] : memref<16x72xbf16, #tpu.memory_space<vmem>>, vector<16x72xbf16>
    %14 = arith.truncf %12 : vector<72x384xf32> to vector<72x384xbf16>
    %cst = arith.constant dense<0.000000e+00> : vector<16x384xf32>
    %15 = tpu.matmul %13, %14, %cst {dimension_numbers = #tpu.dot_dimension_numbers<[1], [0], [0], [1], [0, 0, 1, 1], [], []>} : vector<16x72xbf16>, vector<72x384xbf16>, vector<16x384xf32> -> vector<16x384xf32>
    %c0_4 = arith.constant 0 : index
    %c0_5 = arith.constant 0 : index
    %c0_6 = arith.constant 0 : index
    %16 = vector.load %arg3[%c0_4, %c0_5, %c0_6] : memref<1x16x384xf32, #tpu.memory_space<vmem>>, vector<1x16x384xf32>
    %17 = vector.shape_cast %16 : vector<1x16x384xf32> to vector<16x384xf32>
    %18 = vector.shape_cast %15 : vector<16x384xf32> to vector<1x16x384xf32>
    tpu.vector_store %arg3[%c0_4, %c0_5, %c0_6], %18 {strides = array<i32>} : memref<1x16x384xf32, #tpu.memory_space<vmem>>, vector<1x16x384xf32>,
    return
  }
  func.func @transform_0(%arg0: i32) -> (i32, i32, i32) {
    %c0_i32 = arith.constant 0 : i32
    %c0_i32_0 = arith.constant 0 : i32
    %c0_i32_1 = arith.constant 0 : i32
    return %arg0, %c0_i32, %c0_i32_0 : i32, i32, i32
  }
  func.func @transform_1(%arg0: i32) -> (i32, i32) {
    %c0_i32 = arith.constant 0 : i32
    %c0_i32_0 = arith.constant 0 : i32
    %c0_i32_1 = arith.constant 0 : i32
    return %c0_i32, %c0_i32_0 : i32, i32
  }
  func.func @transform_2(%arg0: i32) -> (i32, i32, i32) {
    %c0_i32 = arith.constant 0 : i32
    %c0_i32_0 = arith.constant 0 : i32
    %c0_i32_1 = arith.constant 0 : i32
    return %arg0, %c0_i32, %c0_i32_0 : i32, i32, i32
  }
}

</mosaic_0001>

<bundles_post_ra>
// kernel: downsample.1
= control target key start
LH: loop header
LB: loop body
LE: loop exit
PB: predicated region body
PF: predicated region fallthrough
CT: control target
= control target key end

     0   :  { %s561_s9 = smov 0   ;;  %s644_s0 = inlined_call_operand.vmem [shape: bf16[2,8,434], index: 0, kind: input, shape index: {}]   ;;  %s645_s1 = inlined_call_operand.vmem [shape: bf16[16,72], index: 1, kind: input, shape index: {}]   ;;  %s646_s2 = inlined_call_operand.vmem [shape: f32[2,16,384], index: 2, kind: output, shape index: {}]  }
   0x1 LB: > { %s414_s10 = sadd.s32 4294967295, %s536_s9   ;;  %p418_p0 = scmp.ge.s32.totalorder %s536_s9, 1  ;;  %s536_s9 = sphi %s561_s9, %s12_s9  }
   0x2   : > { %p112_p1 = scmp.lt.s32.totalorder %s536_s9, 3 }
   0x4   : > { %p113_p2 = pnand %p418_p0, %p112_p1 }
   0x5   : > { %p134_p3 = scmp.lt.s32.totalorder (!%p113_p2), %s414_s10, 1  ;;  %s538_s15 = smov (!%p113_p2), 79  }
   0x6   : > { %116 = sbr.rel (%p113_p2) target bundleno = 318 (0x13e), region = 28  ;;  %s539_s16 = smov (!%p113_p2), 78  }
   0x7   : > { %s540_s17 = smov (!%p113_p2), 103   ;;  %s541_s18 = smov (!%p113_p2), 80  }
   0x8   : > { %s542_s19 = smov (!%p113_p2), 102   ;;  %s543_s20 = smov (!%p113_p2), 126  }
   0x9   : > { %s544_s21 = smov (!%p113_p2), 104   ;;  %s545_s22 = smov (!%p113_p2), 127  }
   0xb   : > { %s648_s10 = smov (!%p134_p3, %s414_s10), 1  ;;  %vm268_vm0 = vcmask 637952   ;;  %vm301_vm1 = vcmask 1043456   ;;  %vm238_vm2 = vcmask 654336   ;;  %vm253_vm3 = vcmask 646144  }
   0xc   : > { %s431_s11 = sshll.u32 %s648_s10, 4  ;;  %vm208_vm4 = vcmask 842752   ;;  %vm223_vm5 = vcmask 834560   ;;  %vm178_vm6 = vcmask 1031168   ;;  %vm193_vm7 = vcmask 850944   ;;  %s433_s25 = smul.u32 48, %s648_s10 }
   0xd   : > { %s138_s14 = scalar_lea.vmem %s644_s0, %s431_s11  ;;  %vm163_vm8 = vcmask 1039360   ;;  %vm297_vm9 = vcmask 588800  }
   0xe   : > { %v575_v0 = vld [vmem:[%s138_s14 + $0x8] sm:$0xff]  ;;  %v579_v3 = vld [vmem:[%s138_s14] sm:$0xff]  ;;  %s143_s28 = scalar_lea.vmem %s646_s2, %s433_s25 }
   0xf   : > { %v149_v1 = vunpack.c.l.bf16 %v575_v0  ;;  %v150_v2 = vunpack.c.h.bf16 %v575_v0  ;;  %v147_v5 = vunpack.c.l.bf16 %v579_v3  ;;  %v148_v6 = vunpack.c.h.bf16 %v579_v3 }
  0x11   : > { %v460_v4 = vpack.i.bf16 %v150_v2, %v149_v1  ;;  %v465_v7 = vpack.i.bf16 %v148_v6, %v147_v5 }
  0x13   : > { %461 = vrot.lane.b32.xlu1 %v460_v4, %s538_s15  ;;  %451 = vrot.lane.b32.xlu0 %v460_v4, %s539_s16 }
  0x14   : > { %471 = vrot.lane.b32.xlu2 %v460_v4, %s540_s17 }
  0x1b   : > { %456 = vrot.lane.b32.xlu0 %v460_v4, %s541_s18  ;;  %466 = vrot.lane.b32.xlu1 %v465_v7, %s539_s16 }
  0x1c   : > { %476 = vrot.lane.b32.xlu2 %v460_v4, %s542_s19 }
  0x23   : > { %481 = vrot.lane.b32.xlu0 %v465_v7, %s541_s18  ;;  %486 = vrot.lane.b32.xlu1 %v465_v7, %s538_s15 }
  0x24   : > { %491 = vrot.lane.b32.xlu2 %v460_v4, %s543_s20 }
  0x2b   : > { %496 = vrot.lane.b32.xlu0 %v460_v4, %s544_s21  ;;  %501 = vrot.lane.b32.xlu1 %v465_v7, %s540_s17 }
  0x2c   : > { %506 = vrot.lane.b32.xlu2 %v465_v7, %s542_s19 }
  0x33   : > { %511 = vrot.lane.b32.xlu0 %v460_v4, %s545_s22  ;;  %516 = vrot.lane.b32.xlu1 %v465_v7, %s543_s20 }
  0x34   : > { %521 = vrot.lane.b32.xlu2 %v465_v7, %s544_s21 }
  0x3b   : > { %526 = vrot.lane.b32.xlu0 %v465_v7, %s545_s22 }
  0x6e   : > { %v589_v8 = vpop.permute.xlu2 %471 }
  0x6f   : > { %v474_v19 = vunpack.i.h.bf16 %v589_v8  ;;  %v473_v20 = vunpack.i.l.bf16 %v589_v8 }
  0x71   : > { %v211_v37 = vsel %vm208_vm4, %v473_v20, %v474_v19 }
  0x76   : > { %v591_v9 = vpop.permute.xlu2 %476 }
  0x77   : > { %v479_v21 = vunpack.i.h.bf16 %v591_v9  ;;  %v478_v22 = vunpack.i.l.bf16 %v591_v9 }
  0x79   : > { %v226_v38 = vsel %vm223_vm5, %v478_v22, %v479_v21 }
  0x7a   : > { %v285_v43 = vpack.c.bf16 %v226_v38, %v211_v37 }
  0x7e   : > { %v599_v25 = vpop.permute.xlu2 %491 }
  0x7f   : > { %v494_v56 = vunpack.i.h.bf16 %v599_v25  ;;  %v493_v57 = vunpack.i.l.bf16 %v599_v25 }
  0x81   : > { %v181_v7 = vsel %vm178_vm6, %v493_v57, %v494_v56 }
  0x85   : > { %v462_v10 = vpop.permute.xlu1 %461  ;;  %v452_v11 = vpop.permute.xlu0 %451 }
  0x86   : > { %v454_v12 = vunpack.i.h.bf16 %v452_v11  ;;  %v453_v13 = vunpack.i.l.bf16 %v452_v11  ;;  %v464_v17 = vunpack.i.h.bf16 %v462_v10  ;;  %v463_v18 = vunpack.i.l.bf16 %v462_v10  ;;  %v507_v48 = vpop.permute.xlu2 %506 }
  0x87   : > { %v508_v53 = vunpack.i.l.bf16 %v507_v48  ;;  %v509_v58 = vunpack.i.h.bf16 %v507_v48 }
  0x88   : > { %v271_v14 = vsel %vm268_vm0, %v453_v13, %v454_v12  ;;  %v256_v31 = vsel %vm253_vm3, %v463_v18, %v464_v17 }
  0x89   : > { %v291_v15 = vpack.c.bf16 %v271_v14, %v271_v14  ;;  %v224_v61 = vsel %vm223_vm5, %v508_v53, %v509_v58  ;;  %v225_v10 = vsel %vm223_vm5, %v509_v58, %v478_v22 }
  0x8b   : > { %v309_v16 = vsel %vm301_vm1, %v291_v15, 0 }
  0x8c   : > { %342 = vmatpush.bf16.msra.mxu2 %v309_v16 }
  0x8d   : > { %v457_v23 = vpop.permute.xlu0 %456  ;;  %v467_v24 = vpop.permute.xlu1 %466 }
  0x8e   : > { %v459_v26 = vunpack.i.h.bf16 %v457_v23  ;;  %v458_v27 = vunpack.i.l.bf16 %v457_v23  ;;  %v469_v28 = vunpack.i.h.bf16 %v467_v24  ;;  %v468_v29 = vunpack.i.l.bf16 %v467_v24  ;;  %v522_v8 = vpop.permute.xlu2 %521 }
  0x8f   : > { %v524_v17 = vunpack.i.h.bf16 %v522_v8 }
  0x90   : > { %v241_v30 = vsel %vm238_vm2, %v458_v27, %v459_v26  ;;  %v270_v32 = vsel %vm268_vm0, %v469_v28, %v453_v13  ;;  %v269_v33 = vsel %vm268_vm0, %v468_v29, %v469_v28  ;;  %v523_v13 = vunpack.i.l.bf16 %v522_v8 }
  0x91   : > { %v288_v34 = vpack.c.bf16 %v256_v31, %v241_v30  ;;  %v290_v35 = vpack.c.bf16 %v270_v32, %v270_v32  ;;  %v289_v36 = vpack.c.bf16 %v269_v33, %v269_v33  ;;  %v432_v32 = vld [vmem:[%s645_s1] sm:$0xff] }
  0x92   : > { %v194_v21 = vsel %vm193_vm7, %v523_v13, %v524_v17 }
  0x93   : > { %343 = vmatpush.bf16.msra.mxu2 %v288_v34  ;;  %v306_v39 = vsel %vm301_vm1, %v290_v35, 0  ;;  %v303_v40 = vsel %vm301_vm1, %v289_v36, 0 }
  0x94   : > { %328 = vmatpush.bf16.msra.mxu1 %v306_v39  ;;  %314 = vmatpush.bf16.msra.mxu0 %v303_v40 }
  0x95   : > { %v482_v41 = vpop.permute.xlu0 %481  ;;  %v487_v42 = vpop.permute.xlu1 %486 }
  0x96   : > { %v484_v44 = vunpack.i.h.bf16 %v482_v41  ;;  %v483_v45 = vunpack.i.l.bf16 %v482_v41  ;;  %v489_v46 = vunpack.i.h.bf16 %v487_v42  ;;  %v488_v47 = vunpack.i.l.bf16 %v487_v42 }
  0x97   : > { %344 = vmatpush.bf16.msra.mxu2 %v285_v43 }
  0x98   : > { %v239_v49 = vsel %vm238_vm2, %v483_v45, %v484_v44  ;;  %v254_v50 = vsel %vm253_vm3, %v488_v47, %v489_v46  ;;  %v240_v51 = vsel %vm238_vm2, %v484_v44, %v458_v27  ;;  %v255_v52 = vsel %vm253_vm3, %v489_v46, %v463_v18 }
  0x99   : > { %v286_v54 = vpack.c.bf16 %v254_v50, %v239_v49  ;;  %v287_v55 = vpack.c.bf16 %v255_v52, %v240_v51 }
  0x9b   : > { %315 = vmatpush.bf16.msra.mxu0 %v286_v54  ;;  %329 = vmatpush.bf16.msra.mxu1 %v287_v55 }
  0x9d   : > { %v497_v59 = vpop.permute.xlu0 %496  ;;  %v502_v60 = vpop.permute.xlu1 %501 }
  0x9e   : > { %v499_v62 = vunpack.i.h.bf16 %v497_v59  ;;  %v498_v63 = vunpack.i.l.bf16 %v497_v59  ;;  %v504_v2 = vunpack.i.h.bf16 %v502_v60  ;;  %v503_v4 = vunpack.i.l.bf16 %v502_v60 }
  0xa0   : > { %v210_v9 = vsel %vm208_vm4, %v504_v2, %v473_v20  ;;  %v196_v11 = vsel %vm193_vm7, %v498_v63, %v499_v62  ;;  %v209_v12 = vsel %vm208_vm4, %v503_v4, %v504_v2  ;;  %v195_v26 = vsel %vm193_vm7, %v524_v17, %v498_v63 }
  0xa1   : > { %v284_v14 = vpack.c.bf16 %v225_v10, %v210_v9  ;;  %v282_v15 = vpack.c.bf16 %v196_v11, %v181_v7  ;;  %v283_v16 = vpack.c.bf16 %v224_v61, %v209_v12 }
  0xa3   : > { %330 = vmatpush.bf16.msra.mxu1 %v284_v14  ;;  %345 = vmatpush.bf16.msra.mxu2 %v282_v15 }
  0xa4   : > { %316 = vmatpush.bf16.msra.mxu0 %v283_v16 }
  0xa5   : > { %v512_v18 = vpop.permute.xlu0 %511  ;;  %v517_v19 = vpop.permute.xlu1 %516 }
  0xa6   : > { %v514_v20 = vunpack.i.h.bf16 %v512_v18  ;;  %v513_v23 = vunpack.i.l.bf16 %v512_v18  ;;  %v519_v22 = vunpack.i.h.bf16 %v517_v19  ;;  %v518_v24 = vunpack.i.l.bf16 %v517_v19 }
  0xa8   : > { %v180_v25 = vsel %vm178_vm6, %v519_v22, %v493_v57  ;;  %v166_v27 = vsel %vm163_vm8, %v513_v23, %v514_v20  ;;  %v179_v28 = vsel %vm178_vm6, %v518_v24, %v519_v22 }
  0xa9   : > { %v281_v29 = vpack.c.bf16 %v195_v26, %v180_v25  ;;  %v279_v30 = vpack.c.bf16 %v166_v27, %v149_v1  ;;  %v280_v31 = vpack.c.bf16 %v194_v21, %v179_v28 }
  0xab   : > { %331 = vmatpush.bf16.msra.mxu1 %v281_v29  ;;  %346 = vmatpush.bf16.msra.mxu2 %v279_v30 }
  0xac   : > { %317 = vmatpush.bf16.msra.mxu0 %v280_v31 }
  0xad   : > { %v527_v33 = vpop.permute.xlu0 %526 }
  0xae   : > { %v529_v34 = vunpack.i.h.bf16 %v527_v33  ;;  %v528_v35 = vunpack.i.l.bf16 %v527_v33  ;;  %428 = vmatmul.msk.bf16.vlgmr.msra.gmra.mxu2 %vm297_vm9, %v432_v32 }
  0xb0   : > { %v164_v36 = vsel %vm163_vm8, %v528_v35, %v529_v34  ;;  %v165_v37 = vsel %vm163_vm8, %v529_v34, %v513_v23 }
  0xb1   : > { %v277_v0 = vpack.c.bf16 %v164_v36, %v147_v5  ;;  %v278_v1 = vpack.c.bf16 %v165_v37, %v148_v6 }
  0xb3   : > { %318 = vmatpush.bf16.msra.mxu0 %v277_v0  ;;  %332 = vmatpush.bf16.msra.mxu1 %v278_v1 }
  0xb6   : > { %426 = vmatmul.msk.bf16.vlgmr.msra.gmra.mxu0 %vm297_vm9, %v432_v32  ;;  %427 = vmatmul.msk.bf16.vlgmr.msra.gmra.mxu1 %vm297_vm9, %v432_v32 }
 0x131   : > { %v348_v38 = vpop.f32.mrf.mxu2 }
 0x132   : > { %355 = vst [vmem:[%s143_s28 + $0x10] sm:$0xff] %v348_v38 }
 0x133   : > { %v320_v39 = vpop.f32.mrf.mxu0  ;;  %v334_v40 = vpop.f32.mrf.mxu1 }
 0x134   : > { %353 = vst [vmem:[%s143_s28] sm:$0xff] %v320_v39 }
 0x135   : > { %354 = vst [vmem:[%s143_s28 + $0x8] sm:$0xff] %v334_v40 }
 0x139   : > { %v350_v41 = vpop.f32.mrf.mxu2 }
 0x13a   : > { %358 = vst [vmem:[%s143_s28 + $0x28] sm:$0xff] %v350_v41 }
 0x13b   : > { %v322_v5 = vpop.f32.mrf.mxu0  ;;  %v336_v3 = vpop.f32.mrf.mxu1 }
 0x13c   : > { %356 = vst [vmem:[%s143_s28 + $0x18] sm:$0xff] %v322_v5 }
 0x13d   : > { %357 = vst [vmem:[%s143_s28 + $0x20] sm:$0xff] %v336_v3 }
 0x13e PF: > { %s12_s9 = sadd.s32 1, %s536_s9  }
 0x13f   : > { %p9_p4 = scmp.ge.s32.totalorder %s12_s9, 4  }
 0x141   :  { %11 = sbr.rel (!%p9_p4) target bundleno = 1 (0x1), region = 58 }

</bundles_post_ra>
